<compile_context>
chip_gen: v5e
topology: v5e:2x2
jax: 0.10.0
libtpu: 0.0.40
codegen_flags: <defaults>
</compile_context>

<pallas_src>
import math

import jax
import jax.numpy as jnp
from jax.experimental import pallas as pl
from jax.experimental.pallas import tpu as pltpu

_LANES = 128
_SUBLANES = 8
_ALIGN = _LANES * _SUBLANES  # 1024 elements


def _build_pe(d_model: int, max_len: int = 5000,
              dtype=jnp.float32) -> jnp.ndarray:
    """Sinusoidal positional-encoding table, identical to the PyTorch buffer."""
    position = jnp.arange(0, max_len, dtype=jnp.float32)[:, None]            # (L, 1)
    div_term = jnp.exp(
        jnp.arange(0, d_model, 2, dtype=jnp.float32)
        * (-math.log(10000.0) / d_model)
    )                                                                         # (ceil(D/2),)
    angles = position * div_term                                              # (L, ceil(D/2))
    pe = jnp.zeros((max_len, d_model), dtype=jnp.float32)
    pe = pe.at[:, 0::2].set(jnp.sin(angles))
    pe = pe.at[:, 1::2].set(jnp.cos(angles)[:, : d_model // 2])               # matches pe[:, 1::2]
    return pe.astype(dtype)


def _pe_add_kernel(x_ref, pe_ref, o_ref):
    # x_ref / o_ref: (1, rows_tile, 128)   pe_ref: (rows_tile, 128)
    o_ref[...] = x_ref[...] + pe_ref[...][None, :, :]


def _target_block_bytes() -> int:
    """~4 MiB x-blocks on v6e/v7x (fast HBM needs bigger steps to amortize the
    ~0.35us per-grid-step overhead); ~2 MiB elsewhere (v5e & older are already
    near roofline at 2 MiB and have a smaller scoped-VMEM default)."""
    try:
        kind = jax.devices()[0].device_kind.lower()
    except Exception:
        return 2 << 20
    if "v6" in kind or "v7" in kind:
        return 4 << 20
    return 2 << 20


def _choose_rows_tile(rows: int, itemsize: int) -> int:
    """Largest multiple of 8 that divides `rows` with block <= target bytes."""
    target_bytes = _target_block_bytes()
    max_rows = max(_SUBLANES,
                   (target_bytes // (_LANES * itemsize)) // _SUBLANES * _SUBLANES)
    tile = max(_SUBLANES, min(rows, max_rows) // _SUBLANES * _SUBLANES)
    while rows % tile != 0:      # rows is a multiple of 8, so this terminates at >= 8
        tile -= _SUBLANES
    return tile


def _pe_add(x: jnp.ndarray, pe2: jnp.ndarray) -> jnp.ndarray:
    """x: (B, S, D); pe2: (rows, 128) padded/flattened pe[:S].  Returns x + pe."""
    B, S, D = x.shape
    total = S * D
    rows = pe2.shape[0]
    total_pad = rows * _LANES
    itemsize = jnp.dtype(x.dtype).itemsize

    x2 = x.reshape(B, total)
    if total_pad != total:
        x2 = jnp.pad(x2, ((0, 0), (0, total_pad - total)))
    x3 = x2.reshape(B, rows, _LANES)

    rows_tile = _choose_rows_tile(rows, itemsize)
    grid = (rows // rows_tile, B)   # batch innermost -> pe block resident across it

    cost = pl.CostEstimate(
        flops=B * total_pad,                                     # one add per element
        bytes_accessed=(2 * B * total_pad + total_pad) * itemsize,
        transcendentals=0,
    )

    out = pl.pallas_call(
        _pe_add_kernel,
        out_shape=jax.ShapeDtypeStruct((B, rows, _LANES), x.dtype),
        grid_spec=pltpu.PrefetchScalarGridSpec(
            num_scalar_prefetch=0,
            grid=grid,
            in_specs=[
                pl.BlockSpec((1, rows_tile, _LANES), lambda r, b: (b, r, 0)),  # x
                pl.BlockSpec((rows_tile, _LANES), lambda r, b: (r, 0)),        # pe (batch-invariant)
            ],
            out_specs=pl.BlockSpec((1, rows_tile, _LANES), lambda r, b: (b, r, 0)),
        ),
        compiler_params=pltpu.CompilerParams(
            dimension_semantics=("parallel", "parallel"),
        ),
        cost_estimate=cost,
    )(x3, pe2)

    out = out.reshape(B, total_pad)
    if total_pad != total:
        out = out[:, :total]
    return out.reshape(B, S, D)


class PositionalEncoding:
    """JAX/Pallas port of the PyTorch PositionalEncoding module (eval mode)."""

    def __init__(self, d_model: int, dropout: float = 0.1, max_len: int = 5000,
                 dtype=jnp.float32):
        self.d_model = d_model
        self.dropout_p = dropout          # eval-mode identity (see TODO at top)
        self.max_len = max_len
        self.pe = _build_pe(d_model, max_len, dtype)
        self._pe_cache = {}               # (seq_len, dtype) -> (rows, 128) table

    def _prepared_pe(self, seq_len: int, dtype) -> jnp.ndarray:
        key = (seq_len, jnp.dtype(dtype).name)
        if key not in self._pe_cache:
            total = seq_len * self.d_model
            total_pad = -(-total // _ALIGN) * _ALIGN
            pe_flat = self.pe[:seq_len, :].astype(dtype).reshape(total)
            if total_pad != total:
                pe_flat = jnp.pad(pe_flat, (0, total_pad - total))
            self._pe_cache[key] = pe_flat.reshape(total_pad // _LANES, _LANES)
        return self._pe_cache[key]

    def __call__(self, x: jnp.ndarray) -> jnp.ndarray:
        B, S, D = x.shape
        assert D == self.d_model, f"d_model mismatch: {D} vs {self.d_model}"
        assert S <= self.max_len
        pe2 = self._prepared_pe(S, x.dtype)
        return _pe_add(x, pe2)


if __name__ == "__main__":
    max_len = 5000
    key = jax.random.PRNGKey(0)

    # Small, non-1024-aligned case (exercises the padded path): B=2, S=8, D=32.
    d_model, seq_len, batch = 32, 8, 2
    x = jax.random.normal(key, (batch, seq_len, d_model), dtype=jnp.float32)
    module = PositionalEncoding(d_model, dropout=0.1, max_len=max_len)
    y = jax.block_until_ready(module(x))
    ref = x + module.pe[:seq_len, :][None, :, :]
    assert y.shape == (batch, seq_len, d_model)
    assert jnp.allclose(y, ref, atol=1e-6), "mismatch vs reference (padded path)"

    # 1024-aligned case (no padding, sublane-dense tiles): B=2, S=32, D=128.
    k2 = jax.random.PRNGKey(1)
    x2 = jax.random.normal(k2, (2, 32, 128), dtype=jnp.float32)
    module2 = PositionalEncoding(128, dropout=0.1, max_len=max_len)
    y2 = jax.block_until_ready(module2(x2))
    ref2 = x2 + module2.pe[:32, :][None, :, :]
    assert jnp.allclose(y2, ref2, atol=1e-6), "mismatch vs reference (aligned path)"

    print("KERNEL_OK")
</pallas_src>

<mosaic_0001>
module attributes {stable_mosaic.version = 11 : i64} {
  func.func @_pe_add_kernel(%arg0: i32, %arg1: i32, %arg2: memref<1x8x128xf32, #tpu.memory_space<vmem>>, %arg3: memref<8x128xf32, #tpu.memory_space<vmem>>, %arg4: memref<1x8x128xf32, #tpu.memory_space<vmem>>) attributes {dimension_semantics = [#tpu.dimension_semantics<parallel>, #tpu.dimension_semantics<parallel>], iteration_bounds = array<i64: 1, 2>, scalar_prefetch = 0 : i64, scratch_operands = 0 : i64, tpu.core_type = #tpu.core_type<tc>, window_params = [{transform_indices = @transform_0, window_bounds = array<i64: 1, 8, 128>}, {transform_indices = @transform_1, window_bounds = array<i64: 8, 128>}, {transform_indices = @transform_2, window_bounds = array<i64: 1, 8, 128>}]} {
    %c0 = arith.constant 0 : index
    %c0_0 = arith.constant 0 : index
    %c0_1 = arith.constant 0 : index
    %0 = vector.load %arg2[%c0, %c0_0, %c0_1] : memref<1x8x128xf32, #tpu.memory_space<vmem>>, vector<1x8x128xf32>
    %c0_2 = arith.constant 0 : index
    %c0_3 = arith.constant 0 : index
    %1 = vector.load %arg3[%c0_2, %c0_3] : memref<8x128xf32, #tpu.memory_space<vmem>>, vector<8x128xf32>
    %2 = vector.shape_cast %1 : vector<8x128xf32> to vector<1x8x128xf32>
    %3 = arith.addf %0, %2 : vector<1x8x128xf32>
    %c0_4 = arith.constant 0 : index
    %c0_5 = arith.constant 0 : index
    %c0_6 = arith.constant 0 : index
    %4 = vector.load %arg4[%c0_4, %c0_5, %c0_6] : memref<1x8x128xf32, #tpu.memory_space<vmem>>, vector<1x8x128xf32>
    tpu.vector_store %arg4[%c0_4, %c0_5, %c0_6], %3 {strides = array<i32>} : memref<1x8x128xf32, #tpu.memory_space<vmem>>, vector<1x8x128xf32>,
    return
  }
  func.func @transform_0(%arg0: i32, %arg1: i32) -> (i32, i32, i32) {
    %c0_i32 = arith.constant 0 : i32
    %c0_i32_0 = arith.constant 0 : i32
    return %arg1, %arg0, %c0_i32 : i32, i32, i32
  }
  func.func @transform_1(%arg0: i32, %arg1: i32) -> (i32, i32) {
    %c0_i32 = arith.constant 0 : i32
    %c0_i32_0 = arith.constant 0 : i32
    return %arg0, %c0_i32 : i32, i32
  }
  func.func @transform_2(%arg0: i32, %arg1: i32) -> (i32, i32, i32) {
    %c0_i32 = arith.constant 0 : i32
    %c0_i32_0 = arith.constant 0 : i32
    return %arg1, %arg0, %c0_i32 : i32, i32, i32
  }
}

</mosaic_0001>

<bundles_post_ra>
// kernel: tpu_custom_call.1
= control target key start
LH: loop header
LB: loop body
LE: loop exit
PB: predicated region body
PF: predicated region fallthrough
CT: control target
= control target key end

     0   :  { %7 = vsyncpa [#allocation3], 0  ;;  %s714_s0 = inlined_call_operand.hbm [shape: f32[2,8,128], index: 0, kind: input, shape index: {}]   ;;  %s715_s1 = inlined_call_operand.hbm [shape: f32[8,128], index: 1, kind: input, shape index: {}]   ;;  %s716_s2 = inlined_call_operand.hbm [shape: f32[2,8,128], index: 2, kind: output, shape index: {}]  }
   0x1   :  { %9 = vsyncpa [#allocation3 + $0x1], 0 }
   0x2   :  { %10 = vsyncpa [#allocation6], 0 }
   0x3   :  { %11 = vsyncpa [#allocation4], 0 }
   0x4   :  { %13 = vsyncpa [#allocation4 + $0x1], 0  ;;  %s565_s9 = smov 0   ;;  %s567_s10 = smov 0  }
   0x5   :  { %s569_s11 = smov 0   ;;  %s571_s12 = smov 0  }
   0x6   :  { %s573_s13 = smov 0   ;;  %s575_s14 = smov 0  }
   0x7 LB: > { %s313_s15 = sadd.s32 4294967295, %s547_s14   ;;  %s314_s16 = sadd.s32 4294967294, %s547_s14   ;;  %s547_s14 = sphi %s575_s14, %s19_s14   ;;  %s543_s13 = sphi %s573_s13, %s728_s13   ;;  %s539_s12 = sphi %s571_s12, %s727_s12   ;;  %s535_s11 = sphi %s569_s11, %s726_s11   ;;  %s531_s10 = sphi %s567_s10, %s725_s10   ;;  %s527_s9 = sphi %s565_s9, %s724_s9  }
   0x8   : > { %p53_p0 = scmp.ne.s32.totalorder %s531_s10, %s527_s9  ;;  %p599_p1 = scmp.eq.s32.totalorder %s313_s15, 0 }
   0x9   : > { %p603_p2 = scmp.eq.s32.totalorder %s313_s15, 1  ;;  %p111_p3 = scmp.eq.s32.totalorder %s314_s16, 1 }
   0xa   : > { %p609_p4 = por %p599_p1, %p53_p0  ;;  %p315_p5 = scmp.ge.s32.totalorder %s547_s14, 1 }
   0xb   : > { %p614_p6 = por %p111_p3, %p53_p0  ;;  %p118_p7 = scmp.lt.s32.totalorder %s547_s14, 3 }
   0xc   : > { %s132_s23 = sshll.u32 %s715_s1, 4  ;;  %p317_p9 = scmp.ge.s32.totalorder %s547_s14, 2  ;;  %s133_s23 = int_to_ptr.hbm [resolvable:$true] %s132_s23 }
   0xd   : > { %p622_p8 = pnand %p315_p5, %p118_p7  ;;  %s549_s25 = smov [#allocation5]  }
   0xe   : > { %s134_s26 = sshll.u32 %s549_s25, 4  ;;  %s28_s27 = sadd.s32 1, %s543_s13  ;;  %s135_s26 = int_to_ptr.vmem [resolvable:$true] %s134_s26 }
   0xf   : > { %p336_p10 = pneg %p622_p8  ;;  %p29_p12 = scmp.ge.s32.totalorder %s28_s27, 2 }
  0x10   : > { %s40_s28 = sadd.s32 1, %s535_s11  ;;  %p47_p13 = scmp.ne.s32.totalorder %s535_s11, %s531_s10 }
  0x11   : > { %p337_p11 = pnand %p336_p10, %p599_p1  ;;  %p48_p0 = scmp.eq.s32.totalorder %s547_s14, 0 }
  0x12   : > { %s730_s27 = smov (%p29_p12, %s28_s27), 0  ;;  %p644_p5 = por %p603_p2, %p47_p13 }
  0x13   : > { %339 = dma.hbm_to_vmem [thread:$0]  (!%p337_p11), %s133_s23, 128, %s135_s26, [#allocation6]  }
  0x14   : > { %p638_p3 = por %p48_p0, %p47_p13  ;;  %s35_s3 = ssub.s32 %s543_s13, %s730_s27 }
  0x15   : > { %p349_p7 = scmp.lt.s32.totalorder %s547_s14, 2  ;;  %p38_p10 = scmp.eq.s32.totalorder %s35_s3, 0 }
  0x16   : > { %s145_s4 = sand.u32 1, %s535_s11   ;;  %s319_s7 = sshll.u32 %s543_s13, 3 }
  0x17   : > { %s318_s5 = sshll.u32 %s145_s4, 3  ;;  %s154_s16 = scalar_lea.hbm %s714_s0, %s319_s7 }
  0x18   : > { %s653_s6 = scalar_select %p38_p10, %s535_s11, %s40_s28  }
  0x19   : > { %s149_s21 = scalar_lea.vmem [#allocation2], %s318_s5  ;;  %s156_s18 = sshll.u32 %s154_s16, 4  ;;  %s157_s18 = int_to_ptr.hbm [resolvable:$true] %s156_s18 }
  0x1a   : > { %s158_s22 = sshll.u32 %s149_s21, 4  ;;  %p341_p2 = pnand %p349_p7, %p638_p3  ;;  %s159_s22 = int_to_ptr.vmem [resolvable:$true] %s158_s22 }
  0x1b   : > { %s146_s23 = scalar_lea.sflag [#allocation3], %s145_s4  ;;  %167 = sbr.rel (%p622_p8) target bundleno = 50 (0x32), region = 28 }
  0x1c   : > { %343 = dma.hbm_to_vmem [thread:$0]  (!%p341_p2), %s157_s18, 128, %s159_s22, %s146_s23  }
  0x1d   : > { %s664_s25 = sand.u32 (!%p622_p8), 1, %s531_s10  }
  0x1e   : > { %s321_s26 = sshll.u32 (!%p622_p8), %s664_s25, 3  ;;  %s170_s28 = scalar_lea.sflag (!%p622_p8), [#allocation3], %s664_s25 }
  0x1f   : > { %s173_s3 = scalar_lea.vmem (!%p622_p8), [#allocation2], %s321_s26 }
  0x20   : > { %514 = dma.done.wait (%p609_p4), %s170_s28, 128  }
  0x21   : > { %516 = vsyncadd (%p609_p4), %s170_s28, 4294967168 }
  0x22   : > { %518 = dma.done.wait (%p599_p1), [#allocation6], 128  }
  0x23   : > { %520 = vsyncadd (%p599_p1), [#allocation6], 4294967168  ;;  %s325_s24 = sshll.u32 %s539_s12, 3  ;;  %s199_s7 = scalar_lea.vmem [#allocation7], %s321_s26  ;;  %v200_v0 = vld [vmem:[%s173_s3] sm:$0xff]  ;;  %v201_v1 = vld [vmem:[#allocation5] sm:$0xff] }
  0x24   : > { %s216_s5 = scalar_lea.hbm %s716_s2, %s325_s24  ;;  %s218_s8 = sshll.u32 %s199_s7, 4  ;;  %v202_v2 = vadd.f32 %v201_v1, %v200_v0  ;;  %s219_s8 = int_to_ptr.vmem [resolvable:$true] %s218_s8 }
  0x25   : > { %s220_s15 = sshll.u32 %s216_s5, 4  ;;  %s205_s19 = scalar_lea.sflag [#allocation4], %s664_s25  ;;  %s221_s15 = int_to_ptr.hbm [resolvable:$true] %s220_s15 }
  0x26   : > { %203 = vst [vmem:[%s199_s7] sm:$0xff] %v202_v2  ;;  %s475_s17 = sshra.s32 %s221_s15, 4  ;;  %s481_s22 = scalar_lea.hbm %s716_s2, 16  ;;  %s476_s17 = int_to_ptr.hbm [resolvable:$true] %s475_s17 }
  0x27   : > { %s477_s16 = scalar_lea.hbm %s476_s17, 8  ;;  %p482_p11 = scmp.lt.s32.totalorder %s476_s17, %s716_s2 }
  0x28   : > { %p478_p1 = scmp.ne.s32.totalorder %s476_s17, %s477_s16  ;;  %p483_p12 = scmp.lt.s32.totalorder %s481_s22, %s477_s16 }
  0x2a   : > { %p479_p4 = pnand %p478_p1, %p644_p5  ;;  %p484_p13 = por %p483_p12, %p482_p11 }
  0x2c   : > { %p480_p8 = pneg %p479_p4 }
  0x2e   : > { %p485_p0 = pnand %p484_p13, %p480_p8 }
  0x30   : > { %488 = shalt.err (!%p485_p0)
}
  0x31   : > { %334 = dma.vmem_to_hbm [thread:$0]  (%p644_p5), %s219_s8, 128, %s221_s15, %s205_s19  }
  0x32 PF: > { %s232_s25 = sand.u32 1, %s527_s9   ;;  %p345_p3 = pnand %p317_p9, %p614_p6 }
  0x33   : > { %s233_s26 = scalar_lea.sflag [#allocation4], %s232_s25 }
  0x34   : > { %p346_p7 = pneg %p345_p3 }
  0x36   : > { %522 = dma.done.wait (%p346_p7), %s233_s26, 128  }
  0x37   : > { %524 = vsyncadd (%p346_p7), %s233_s26, 4294967168  ;;  %s19_s14 = sadd.s32 1, %s547_s14   ;;  %s724_s9 = smov %s531_s10 }
  0x38   : > { %p16_p10 = scmp.ge.s32.totalorder %s19_s14, 4   ;;  %s725_s10 = smov %s535_s11 }
  0x39   : > { %s726_s11 = smov %s653_s6  ;;  %s727_s12 = smov %s543_s13 }
  0x3a   : > { %s728_s13 = smov %s730_s27  ;;  %18 = sbr.rel (!%p16_p10) target bundleno = 7 (0x7), region = 78 }
  0x3f   :  { %239 = vsyncpa [#allocation3], 1 }
  0x40   :  { %241 = vsyncpa [#allocation3 + $0x1], 1 }
  0x41   :  { %242 = vsyncpa [#allocation6], 1 }
  0x42   :  { %243 = vsyncpa [#allocation4], 1 }
  0x43   :  { %245 = vsyncpa [#allocation4 + $0x1], 1 }

</bundles_post_ra>
